<compile_context>
chip_gen: v5e
topology: v5e:2x2
jax: 0.10.0
libtpu: 0.0.40
codegen_flags: <defaults>
</compile_context>

<pallas_src>
import functools

import jax
import jax.numpy as jnp
from jax import lax
from jax.experimental import pallas as pl
from jax.experimental.pallas import tpu as pltpu

_NEG_BIG = -1e30  # finite "-inf": exp(_NEG_BIG - m) underflows to 0.0, no NaNs


def clip_loss_kernel(scale_ref, img_rows_ref, txt_rows_ref,
                     txt_cols_ref, img_cols_ref, out_ref,
                     m_img_ref, l_img_ref, m_txt_ref, l_txt_ref,
                     *, tn, n_valid, n_pad, mm_dtype):
    """One (row-block i, col-block j) step of the streaming CLIP loss."""
    j = pl.program_id(1)
    nj = pl.num_programs(1)

    @pl.when(j == 0)
    def _init():
        m_img_ref[...] = jnp.full(m_img_ref.shape, _NEG_BIG, m_img_ref.dtype)
        l_img_ref[...] = jnp.zeros(l_img_ref.shape, l_img_ref.dtype)
        m_txt_ref[...] = jnp.full(m_txt_ref.shape, _NEG_BIG, m_txt_ref.dtype)
        l_txt_ref[...] = jnp.zeros(l_txt_ref.shape, l_txt_ref.dtype)

    scale = scale_ref[0]                          # f32 scalar (SMEM)

    img_rows = img_rows_ref[...]                  # (TM, D)
    txt_rows = txt_rows_ref[...]                  # (TM, D)
    txt_cols = txt_cols_ref[...]                  # (D, TN)  pre-transposed
    img_cols = img_cols_ref[...]                  # (D, TN)  pre-transposed

    if mm_dtype is not None:                      # optional f32 -> bf16 MXU cast
        img_mm = img_rows.astype(mm_dtype)
        txt_mm = txt_rows.astype(mm_dtype)
        txt_cols = txt_cols.astype(mm_dtype)
        img_cols = img_cols.astype(mm_dtype)
    else:
        img_mm, txt_mm = img_rows, txt_rows

    # Plain (TM, D) x (D, TN) contractions (contraction dim already on the
    # RHS sublane axis -> no in-kernel transpose).  Scale is applied to the
    # f32 accumulator, keeping the exact f32 logit scaling of the reference.
    dn = (((1,), (0,)), ((), ()))
    logits_i = scale * lax.dot_general(img_mm, txt_cols, dn,
                                       preferred_element_type=jnp.float32)
    logits_t = scale * lax.dot_general(txt_mm, img_cols, dn,
                                       preferred_element_type=jnp.float32)

    if n_valid != n_pad:                          # static: mask padded columns
        col = tn * j + lax.broadcasted_iota(jnp.int32, logits_i.shape, 1)
        valid = col < n_valid
        logits_i = jnp.where(valid, logits_i, _NEG_BIG)
        logits_t = jnp.where(valid, logits_t, _NEG_BIG)

    def online_lse_update(m_ref, l_ref, s):       # flash-style running LSE
        m_prev = m_ref[...]
        m_new = jnp.maximum(m_prev, jnp.max(s, axis=-1, keepdims=True))
        alpha = jnp.exp(m_prev - m_new)
        l_ref[...] = alpha * l_ref[...] + jnp.sum(jnp.exp(s - m_new),
                                                  axis=-1, keepdims=True)
        m_ref[...] = m_new

    online_lse_update(m_img_ref, l_img_ref, logits_i)
    online_lse_update(m_txt_ref, l_txt_ref, logits_t)

    @pl.when(j == nj - 1)
    def _finalize():
        # Label (diagonal) logit of row r: scale * <img_r, txt_r>, f32 VPU.
        diag = scale * jnp.sum(img_rows.astype(jnp.float32) *
                               txt_rows.astype(jnp.float32),
                               axis=-1, keepdims=True)                # (TM, 1)
        lse_i = m_img_ref[...] + jnp.log(l_img_ref[...])
        lse_t = m_txt_ref[...] + jnp.log(l_txt_ref[...])
        # TODO(synk): a lane-major (1, TM) output tile would avoid the
        # lane-sparse (TM, 1) writeback; output is only N floats so the
        # simpler layout is kept.
        out_ref[...] = (lse_i - diag) + (lse_t - diag)                # (TM, 1)


def _round_up(x, m):
    return ((x + m - 1) // m) * m


def clip_loss(image_features, text_features, logit_scale, *, bf16_matmul=False):
    """Pallas ClipLoss (world_size=1).  Returns a scalar float32 loss."""
    assert image_features.shape == text_features.shape
    assert image_features.ndim == 2
    n, d = image_features.shape

    # With the streaming (online-LSE) column axis, VMEM is independent of N,
    # so a single tile choice fits v5e / v6e / v7x alike.
    tile = 256 if n > 256 else _round_up(n, 8)
    tm = tn = tile
    n_pad = _round_up(n, tile)

    if n_pad != n:   # pad-and-mask instead of an O(N^2) single-block fallback
        pad = n_pad - n
        image_features = jnp.pad(image_features, ((0, pad), (0, 0)))
        text_features = jnp.pad(text_features, ((0, pad), (0, 0)))

    # One-time HBM transposes so the kernel RHS operands are already (D, N).
    txt_t = text_features.T
    img_t = image_features.T

    scale = jnp.asarray(logit_scale, jnp.float32).reshape(1)
    mm_dtype = (jnp.bfloat16
                if (bf16_matmul and image_features.dtype == jnp.float32)
                else None)

    grid = (n_pad // tm, n_pad // tn)

    # Explicit VMEM budget: double-buffered feature tiles + output tile +
    # LSE accumulators + f32 logit/exp temporaries, with 2x headroom.
    in_bytes = jnp.dtype(image_features.dtype).itemsize
    est = (2 * 2 * tm * d * in_bytes        # img/txt row tiles (2-buffered)
           + 2 * 2 * d * tn * in_bytes      # txt/img col tiles (2-buffered)
           + 2 * tm * 4 + 4 * tm * 4        # out tile + scratch accumulators
           + 8 * tm * tn * 4)               # f32 logit / exp temporaries
    vmem_limit = int(min(max(2 * est, 32 * 1024 * 1024), 64 * 1024 * 1024))

    kernel = functools.partial(clip_loss_kernel, tn=tn, n_valid=n,
                               n_pad=n_pad, mm_dtype=mm_dtype)

    per_row = pl.pallas_call(
        kernel,
        out_shape=jax.ShapeDtypeStruct((n_pad, 1), jnp.float32),
        grid=grid,
        in_specs=[
            pl.BlockSpec(memory_space=pltpu.MemorySpace.SMEM),   # logit_scale
            pl.BlockSpec((tm, d), lambda i, j: (i, 0)),          # image rows
            pl.BlockSpec((tm, d), lambda i, j: (i, 0)),          # text rows
            pl.BlockSpec((d, tn), lambda i, j: (0, j)),          # text cols^T
            pl.BlockSpec((d, tn), lambda i, j: (0, j)),          # image cols^T
        ],
        out_specs=pl.BlockSpec((tm, 1), lambda i, j: (i, 0)),
        scratch_shapes=[pltpu.VMEM((tm, 1), jnp.float32)] * 4,
        compiler_params=pltpu.CompilerParams(
            dimension_semantics=("parallel", "arbitrary"),
            vmem_limit_bytes=vmem_limit,
        ),
    )(scale, image_features, text_features, txt_t, img_t)

    # F.cross_entropy uses mean reduction; average both directions and drop
    # padded rows.
    return jnp.sum(per_row[:n, 0]) / (2.0 * n)


def clip_loss_ref(image_features, text_features, logit_scale):
    logits = logit_scale * jnp.dot(image_features, text_features.T,
                                   precision=lax.Precision.HIGHEST)
    labels = jnp.arange(logits.shape[0])

    def ce(lg):
        lse = jax.scipy.special.logsumexp(lg, axis=1)
        return jnp.mean(lse - lg[jnp.arange(lg.shape[0]), labels])

    return 0.5 * (ce(logits) + ce(logits.T))


def _make_inputs(key, n, dim, dtype=jnp.float32):
    k1, k2 = jax.random.split(key)
    img = jax.random.normal(k1, (n, dim), dtype=jnp.float32)
    txt = jax.random.normal(k2, (n, dim), dtype=jnp.float32)
    img = img / jnp.linalg.norm(img, axis=-1, keepdims=True)
    txt = txt / jnp.linalg.norm(txt, axis=-1, keepdims=True)
    return img.astype(dtype), txt.astype(dtype)


if __name__ == "__main__":
    # OpenAI CLIP init: logit_scale = exp(log(1/0.07)).
    logit_scale = jnp.exp(jnp.log(jnp.float32(1.0 / 0.07)))
    key = jax.random.PRNGKey(0)

    def check(name, n, dim, dtype, tol):
        img, txt = _make_inputs(key, n, dim, dtype)
        loss = clip_loss(img, txt, logit_scale)
        jax.block_until_ready(loss)
        ref = clip_loss_ref(img.astype(jnp.float32), txt.astype(jnp.float32),
                            logit_scale)
        assert jnp.allclose(loss, ref, atol=tol, rtol=tol), (name, loss, ref)

    check("small-single-block", 8, 32, jnp.float32, 2e-3)     # grid (1,1)
    check("multi-block", 512, 32, jnp.float32, 2e-3)          # grid (2,2)
    check("ragged-pad-mask", 300, 32, jnp.float32, 2e-3)      # pad 300 -> 512
    check("bf16-inputs", 384, 64, jnp.bfloat16, 5e-3)         # bf16 MXU path
    print("KERNEL_OK")
</pallas_src>

<mosaic_0001>
module attributes {stable_mosaic.version = 11 : i64} {
  func.func @clip_loss_kernel(%arg0: i32, %arg1: i32, %arg2: memref<1xf32, #tpu.memory_space<smem>>, %arg3: memref<8x32xf32, #tpu.memory_space<vmem>>, %arg4: memref<8x32xf32, #tpu.memory_space<vmem>>, %arg5: memref<32x8xf32, #tpu.memory_space<vmem>>, %arg6: memref<32x8xf32, #tpu.memory_space<vmem>>, %arg7: memref<8x1xf32, #tpu.memory_space<vmem>>, %arg8: memref<8x1xf32, #tpu.memory_space<vmem>>, %arg9: memref<8x1xf32, #tpu.memory_space<vmem>>, %arg10: memref<8x1xf32, #tpu.memory_space<vmem>>, %arg11: memref<8x1xf32, #tpu.memory_space<vmem>>) attributes {dimension_semantics = [#tpu.dimension_semantics<parallel>, #tpu.dimension_semantics<arbitrary>], iteration_bounds = array<i64: 1, 1>, scalar_prefetch = 0 : i64, scratch_operands = 4 : i64, tpu.core_type = #tpu.core_type<tc>, window_params = [{transform_indices = @transform_0, window_bounds = array<i64: 1>}, {transform_indices = @transform_1, window_bounds = array<i64: 8, 32>}, {transform_indices = @transform_2, window_bounds = array<i64: 8, 32>}, {transform_indices = @transform_3, window_bounds = array<i64: 32, 8>}, {transform_indices = @transform_4, window_bounds = array<i64: 32, 8>}, {transform_indices = @transform_5, window_bounds = array<i64: 8, 1>}]} {
    %c0_i32 = arith.constant 0 : i32
    %0 = arith.cmpi eq, %arg1, %c0_i32 : i32
    %1 = arith.extui %0 : i1 to i32
    %c0_i32_0 = arith.constant 0 : i32
    %2 = arith.cmpi ne, %1, %c0_i32_0 : i32
    scf.if %2 {
      %cst_32 = arith.constant -1.000000e+30 : f32
      %49 = vector.broadcast %cst_32 : f32 to vector<8x1xf32>
      %c0_33 = arith.constant 0 : index
      %c0_34 = arith.constant 0 : index
      %50 = vector.load %arg8[%c0_33, %c0_34] : memref<8x1xf32, #tpu.memory_space<vmem>>, vector<8x1xf32>
      tpu.vector_store %arg8[%c0_33, %c0_34], %49 {strides = array<i32>} : memref<8x1xf32, #tpu.memory_space<vmem>>, vector<8x1xf32>,
      %cst_35 = arith.constant 0.000000e+00 : f32
      %51 = vector.broadcast %cst_35 : f32 to vector<8x1xf32>
      %c0_36 = arith.constant 0 : index
      %c0_37 = arith.constant 0 : index
      %52 = vector.load %arg9[%c0_36, %c0_37] : memref<8x1xf32, #tpu.memory_space<vmem>>, vector<8x1xf32>
      tpu.vector_store %arg9[%c0_36, %c0_37], %51 {strides = array<i32>} : memref<8x1xf32, #tpu.memory_space<vmem>>, vector<8x1xf32>,
      %cst_38 = arith.constant -1.000000e+30 : f32
      %53 = vector.broadcast %cst_38 : f32 to vector<8x1xf32>
      %c0_39 = arith.constant 0 : index
      %c0_40 = arith.constant 0 : index
      %54 = vector.load %arg10[%c0_39, %c0_40] : memref<8x1xf32, #tpu.memory_space<vmem>>, vector<8x1xf32>
      tpu.vector_store %arg10[%c0_39, %c0_40], %53 {strides = array<i32>} : memref<8x1xf32, #tpu.memory_space<vmem>>, vector<8x1xf32>,
      %cst_41 = arith.constant 0.000000e+00 : f32
      %55 = vector.broadcast %cst_41 : f32 to vector<8x1xf32>
      %c0_42 = arith.constant 0 : index
      %c0_43 = arith.constant 0 : index
      %56 = vector.load %arg11[%c0_42, %c0_43] : memref<8x1xf32, #tpu.memory_space<vmem>>, vector<8x1xf32>
      tpu.vector_store %arg11[%c0_42, %c0_43], %55 {strides = array<i32>} : memref<8x1xf32, #tpu.memory_space<vmem>>, vector<8x1xf32>,
    } else {
    }
    %c0 = arith.constant 0 : index
    %3 = memref.load %arg2[%c0] : memref<1xf32, #tpu.memory_space<smem>>
    %c0_1 = arith.constant 0 : index
    %c0_2 = arith.constant 0 : index
    %4 = vector.load %arg3[%c0_1, %c0_2] : memref<8x32xf32, #tpu.memory_space<vmem>>, vector<8x32xf32>
    %c0_3 = arith.constant 0 : index
    %c0_4 = arith.constant 0 : index
    %5 = vector.load %arg4[%c0_3, %c0_4] : memref<8x32xf32, #tpu.memory_space<vmem>>, vector<8x32xf32>
    %c0_5 = arith.constant 0 : index
    %c0_6 = arith.constant 0 : index
    %6 = vector.load %arg5[%c0_5, %c0_6] : memref<32x8xf32, #tpu.memory_space<vmem>>, vector<32x8xf32>
    %c0_7 = arith.constant 0 : index
    %c0_8 = arith.constant 0 : index
    %7 = vector.load %arg6[%c0_7, %c0_8] : memref<32x8xf32, #tpu.memory_space<vmem>>, vector<32x8xf32>
    %cst = arith.constant dense<0.000000e+00> : vector<8x8xf32>
    %8 = tpu.matmul %4, %6, %cst {dimension_numbers = #tpu.dot_dimension_numbers<[1], [0], [0], [1], [0, 0, 1, 1], [], []>} : vector<8x32xf32>, vector<32x8xf32>, vector<8x8xf32> -> vector<8x8xf32>
    %9 = vector.broadcast %3 : f32 to vector<8x8xf32>
    %10 = arith.mulf %9, %8 : vector<8x8xf32>
    %cst_9 = arith.constant dense<0.000000e+00> : vector<8x8xf32>
    %11 = tpu.matmul %5, %7, %cst_9 {dimension_numbers = #tpu.dot_dimension_numbers<[1], [0], [0], [1], [0, 0, 1, 1], [], []>} : vector<8x32xf32>, vector<32x8xf32>, vector<8x8xf32> -> vector<8x8xf32>
    %12 = vector.broadcast %3 : f32 to vector<8x8xf32>
    %13 = arith.mulf %12, %11 : vector<8x8xf32>
    %c0_10 = arith.constant 0 : index
    %c0_11 = arith.constant 0 : index
    %14 = vector.load %arg8[%c0_10, %c0_11] : memref<8x1xf32, #tpu.memory_space<vmem>>, vector<8x1xf32>
    %cst_12 = arith.constant dense<0xFF800000> : vector<8xf32>
    %15 = vector.multi_reduction <maximumf>, %10, %cst_12 [1] : vector<8x8xf32> to vector<8xf32>
    %16 = vector.shape_cast %15 : vector<8xf32> to vector<8x1xf32>
    %17 = arith.maximumf %14, %16 : vector<8x1xf32>
    %18 = arith.subf %14, %17 : vector<8x1xf32>
    %19 = math.exp %18 : vector<8x1xf32>
    %c0_13 = arith.constant 0 : index
    %c0_14 = arith.constant 0 : index
    %20 = vector.load %arg9[%c0_13, %c0_14] : memref<8x1xf32, #tpu.memory_space<vmem>>, vector<8x1xf32>
    %21 = arith.mulf %19, %20 : vector<8x1xf32>
    %22 = vector.broadcast %17 : vector<8x1xf32> to vector<8x8xf32>
    %23 = arith.subf %10, %22 : vector<8x8xf32>
    %24 = math.exp %23 : vector<8x8xf32>
    %cst_15 = arith.constant dense<0.000000e+00> : vector<8xf32>
    %25 = vector.multi_reduction <add>, %24, %cst_15 [1] : vector<8x8xf32> to vector<8xf32>
    %26 = vector.shape_cast %25 : vector<8xf32> to vector<8x1xf32>
    %27 = arith.addf %21, %26 : vector<8x1xf32>
    %c0_16 = arith.constant 0 : index
    %c0_17 = arith.constant 0 : index
    %28 = vector.load %arg9[%c0_16, %c0_17] : memref<8x1xf32, #tpu.memory_space<vmem>>, vector<8x1xf32>
    tpu.vector_store %arg9[%c0_16, %c0_17], %27 {strides = array<i32>} : memref<8x1xf32, #tpu.memory_space<vmem>>, vector<8x1xf32>,
    %c0_18 = arith.constant 0 : index
    %c0_19 = arith.constant 0 : index
    %29 = vector.load %arg8[%c0_18, %c0_19] : memref<8x1xf32, #tpu.memory_space<vmem>>, vector<8x1xf32>
    tpu.vector_store %arg8[%c0_18, %c0_19], %17 {strides = array<i32>} : memref<8x1xf32, #tpu.memory_space<vmem>>, vector<8x1xf32>,
    %c0_20 = arith.constant 0 : index
    %c0_21 = arith.constant 0 : index
    %30 = vector.load %arg10[%c0_20, %c0_21] : memref<8x1xf32, #tpu.memory_space<vmem>>, vector<8x1xf32>
    %cst_22 = arith.constant dense<0xFF800000> : vector<8xf32>
    %31 = vector.multi_reduction <maximumf>, %13, %cst_22 [1] : vector<8x8xf32> to vector<8xf32>
    %32 = vector.shape_cast %31 : vector<8xf32> to vector<8x1xf32>
    %33 = arith.maximumf %30, %32 : vector<8x1xf32>
    %34 = arith.subf %30, %33 : vector<8x1xf32>
    %35 = math.exp %34 : vector<8x1xf32>
    %c0_23 = arith.constant 0 : index
    %c0_24 = arith.constant 0 : index
    %36 = vector.load %arg11[%c0_23, %c0_24] : memref<8x1xf32, #tpu.memory_space<vmem>>, vector<8x1xf32>
    %37 = arith.mulf %35, %36 : vector<8x1xf32>
    %38 = vector.broadcast %33 : vector<8x1xf32> to vector<8x8xf32>
    %39 = arith.subf %13, %38 : vector<8x8xf32>
    %40 = math.exp %39 : vector<8x8xf32>
    %cst_25 = arith.constant dense<0.000000e+00> : vector<8xf32>
    %41 = vector.multi_reduction <add>, %40, %cst_25 [1] : vector<8x8xf32> to vector<8xf32>
    %42 = vector.shape_cast %41 : vector<8xf32> to vector<8x1xf32>
    %43 = arith.addf %37, %42 : vector<8x1xf32>
    %c0_26 = arith.constant 0 : index
    %c0_27 = arith.constant 0 : index
    %44 = vector.load %arg11[%c0_26, %c0_27] : memref<8x1xf32, #tpu.memory_space<vmem>>, vector<8x1xf32>
    tpu.vector_store %arg11[%c0_26, %c0_27], %43 {strides = array<i32>} : memref<8x1xf32, #tpu.memory_space<vmem>>, vector<8x1xf32>,
    %c0_28 = arith.constant 0 : index
    %c0_29 = arith.constant 0 : index
    %45 = vector.load %arg10[%c0_28, %c0_29] : memref<8x1xf32, #tpu.memory_space<vmem>>, vector<8x1xf32>
    tpu.vector_store %arg10[%c0_28, %c0_29], %33 {strides = array<i32>} : memref<8x1xf32, #tpu.memory_space<vmem>>, vector<8x1xf32>,
    %c0_i32_30 = arith.constant 0 : i32
    %46 = arith.cmpi eq, %arg1, %c0_i32_30 : i32
    %47 = arith.extui %46 : i1 to i32
    %c0_i32_31 = arith.constant 0 : i32
    %48 = arith.cmpi ne, %47, %c0_i32_31 : i32
    scf.if %48 {
      %49 = arith.mulf %4, %5 : vector<8x32xf32>
      %cst_32 = arith.constant dense<0.000000e+00> : vector<8xf32>
      %50 = vector.multi_reduction <add>, %49, %cst_32 [1] : vector<8x32xf32> to vector<8xf32>
      %51 = vector.shape_cast %50 : vector<8xf32> to vector<8x1xf32>
      %52 = vector.broadcast %3 : f32 to vector<8x1xf32>
      %53 = arith.mulf %52, %51 : vector<8x1xf32>
      %c0_33 = arith.constant 0 : index
      %c0_34 = arith.constant 0 : index
      %54 = vector.load %arg8[%c0_33, %c0_34] : memref<8x1xf32, #tpu.memory_space<vmem>>, vector<8x1xf32>
      %c0_35 = arith.constant 0 : index
      %c0_36 = arith.constant 0 : index
      %55 = vector.load %arg9[%c0_35, %c0_36] : memref<8x1xf32, #tpu.memory_space<vmem>>, vector<8x1xf32>
      %56 = math.log %55 : vector<8x1xf32>
      %57 = arith.addf %54, %56 : vector<8x1xf32>
      %c0_37 = arith.constant 0 : index
      %c0_38 = arith.constant 0 : index
      %58 = vector.load %arg10[%c0_37, %c0_38] : memref<8x1xf32, #tpu.memory_space<vmem>>, vector<8x1xf32>
      %c0_39 = arith.constant 0 : index
      %c0_40 = arith.constant 0 : index
      %59 = vector.load %arg11[%c0_39, %c0_40] : memref<8x1xf32, #tpu.memory_space<vmem>>, vector<8x1xf32>
      %60 = math.log %59 : vector<8x1xf32>
      %61 = arith.addf %58, %60 : vector<8x1xf32>
      %62 = arith.subf %57, %53 : vector<8x1xf32>
      %63 = arith.subf %61, %53 : vector<8x1xf32>
      %64 = arith.addf %62, %63 : vector<8x1xf32>
      %c0_41 = arith.constant 0 : index
      %c0_42 = arith.constant 0 : index
      %65 = vector.load %arg7[%c0_41, %c0_42] : memref<8x1xf32, #tpu.memory_space<vmem>>, vector<8x1xf32>
      tpu.vector_store %arg7[%c0_41, %c0_42], %64 {strides = array<i32>} : memref<8x1xf32, #tpu.memory_space<vmem>>, vector<8x1xf32>,
    } else {
    }
    return
  }
  func.func @transform_0(%arg0: i32, %arg1: i32) -> i32 {
    %c0_i32 = arith.constant 0 : i32
    %c0_i32_0 = arith.constant 0 : i32
    return %c0_i32 : i32
  }
  func.func @transform_1(%arg0: i32, %arg1: i32) -> (i32, i32) {
    %c0_i32 = arith.constant 0 : i32
    %c0_i32_0 = arith.constant 0 : i32
    return %arg0, %c0_i32 : i32, i32
  }
  func.func @transform_2(%arg0: i32, %arg1: i32) -> (i32, i32) {
    %c0_i32 = arith.constant 0 : i32
    %c0_i32_0 = arith.constant 0 : i32
    return %arg0, %c0_i32 : i32, i32
  }
  func.func @transform_3(%arg0: i32, %arg1: i32) -> (i32, i32) {
    %c0_i32 = arith.constant 0 : i32
    %c0_i32_0 = arith.constant 0 : i32
    return %c0_i32, %arg1 : i32, i32
  }
  func.func @transform_4(%arg0: i32, %arg1: i32) -> (i32, i32) {
    %c0_i32 = arith.constant 0 : i32
    %c0_i32_0 = arith.constant 0 : i32
    return %c0_i32, %arg1 : i32, i32
  }
  func.func @transform_5(%arg0: i32, %arg1: i32) -> (i32, i32) {
    %c0_i32 = arith.constant 0 : i32
    %c0_i32_0 = arith.constant 0 : i32
    return %arg0, %c0_i32 : i32, i32
  }
}

</mosaic_0001>

<bundles_post_ra>
// kernel: tpu_custom_call.1
= control target key start
LH: loop header
LB: loop body
LE: loop exit
PB: predicated region body
PF: predicated region fallthrough
CT: control target
= control target key end

     0   :  { %vm41_vm0 = vcmask 261120   ;;  %vm25_vm1 = vcmask 7168   ;;  %v186_v10 = vmov -1e+30   ;;  %vm92_vm2 = vcmask 64512   ;;  %s276_s3 = inlined_call_operand.vmem [shape: f32[32,8], index: 3, kind: input, shape index: {}]   ;;  %s277_s4 = inlined_call_operand.vmem [shape: f32[32,8], index: 4, kind: input, shape index: {}]   ;;  %s278_s1 = inlined_call_operand.vmem [shape: f32[8,32], index: 1, kind: input, shape index: {}]   ;;  %s279_s2 = inlined_call_operand.vmem [shape: f32[8,32], index: 2, kind: input, shape index: {}]   ;;  %s280_s0 = inlined_call_operand.<no memory space> [shape: f32[1], index: 0, kind: input, shape index: {}]   ;;  %s281_s5 = inlined_call_operand.vmem [shape: f32[8,1], index: 5, kind: output, shape index: {}]  }
   0x1   :  { %v36_v0 = vld [vmem:[%s276_s3 + $0x18] sm:$0xff]  ;;  %v35_v1 = vld [vmem:[%s276_s3 + $0x10] sm:$0xff]  ;;  %v34_v3 = vld [vmem:[%s276_s3 + $0x8] sm:$0xff]  ;;  %26 = vst.msk [vmem:[#allocation2] sm:$0xff] %vm25_vm1, %v186_v10  ;;  %v256_v11 = vstv %s280_s0  ;;  %v187_v18 = vmov 0   ;;  %v188_v19 = vmov 0.0  }
   0x2   :  { %57 = vmatpush.msra.mxu0 %v36_v0  ;;  %v40_v2 = vld [vmem:[%s277_s4 + $0x18] sm:$0xff]  ;;  %v39_v4 = vld [vmem:[%s277_s4 + $0x10] sm:$0xff]  ;;  %v38_v5 = vld [vmem:[%s277_s4 + $0x8] sm:$0xff]  ;;  %28 = vst.msk [vmem:[#allocation4] sm:$0xff] %vm25_vm1, %v186_v10  ;;  %172 = vset.pattern.permute.xlu1 %v187_v18 }
   0x3   :  { %82 = vmatpush.msra.mxu1 %v40_v2  ;;  %v33_v6 = vld [vmem:[%s276_s3] sm:$0xff]  ;;  %173 = vset.pattern.permute.xlu0 %v187_v18  ;;  %27 = vst.msk [vmem:[#allocation3] sm:$0xff] %vm25_vm1, %v188_v19 }
   0x4   :  { %58 = vmatpush.msra.mxu0 %v35_v1  ;;  %v31_v7 = vld [vmem:[%s278_s1] sm:$0xff]  ;;  %29 = vst.msk [vmem:[#allocation5] sm:$0xff] %vm25_vm1, %v188_v19 }
   0x5   :  { %83 = vmatpush.msra.mxu1 %v39_v4  ;;  %v37_v8 = vld [vmem:[%s277_s4] sm:$0xff] }
   0x6   :  { %59 = vmatpush.msra.mxu0 %v34_v3  ;;  %v32_v9 = vld [vmem:[%s279_s2] sm:$0xff] }
   0x7   :  { %84 = vmatpush.msra.mxu1 %v38_v5  ;;  %v144_v28 = vmul.f32 %v32_v9, %v31_v7 }
   0x8   :  { %60 = vmatpush.msra.mxu0 %v33_v6  ;;  %v91_v20 = vld [vmem:[#allocation2] sm:$0xff] }
   0x9   :  { %167 = vmatmul.msk.f32.vlgmr.msra.gmra.mxu0 %vm41_vm0, %v31_v7  ;;  %85 = vmatpush.msra.mxu1 %v37_v8  ;;  %v117_v24 = vld [vmem:[#allocation4] sm:$0xff]  ;;  %v145_v29 = vsel %vm41_vm0, %v144_v28, 0.0 }
   0xa   :  { %168 = vmatmul.msk.f32.vlgmr.msra.gmra.mxu1 %vm41_vm0, %v32_v9  ;;  %v100_v43 = vld [vmem:[#allocation3] sm:$0xff] }
   0xb   :  { %v125_v48 = vld [vmem:[#allocation5] sm:$0xff] }
  0x86   :  { %v62_v12 = vpop.f32.mrf.mxu0 }
  0x87   :  { %v66_v13 = vmul.f32 %v256_v11, %v62_v12  ;;  %v87_v14 = vpop.f32.mrf.mxu1 }
  0x88   :  { %v90_v16 = vmul.f32 %v87_v14, %v256_v11 }
  0x89   :  { %v93_v15 = vsel %vm92_vm2, %v66_v13, -inf }
  0x8a   :  { %94 = vmax.xlane.f32.xlu0 %v93_v15  ;;  %v118_v17 = vsel %vm92_vm2, %v90_v16, -inf }
  0x92   :  { %119 = vmax.xlane.f32.xlu0 %v118_v17 }
  0x9a   :  { %146 = vadd.xlane.f32.xlu0 %v145_v29 }
  0xfd   :  { %v95_v21 = vpop.xlane.xlu0 %94 }
  0xfe   :  { %v96_v22 = vmax.f32 %v91_v20, %v95_v21 }
 0x100   :  { %v97_v23 = vsub.f32 %v91_v20, %v96_v22  ;;  %116 = vst.msk [vmem:[#allocation2] sm:$0xff] %vm25_vm1, %v96_v22  ;;  %104 = vperm.xlu1 %172, %v96_v22  }
 0x102   :  { %v98_v40 = vmul.f32 1.442695, %v97_v23 }
 0x105   :  { %v120_v25 = vpop.xlane.xlu0 %119 }
 0x106   :  { %v121_v26 = vmax.f32 %v117_v24, %v120_v25 }
 0x107   :  { %v149_v58 = vld [vmem:[#allocation2] sm:$0xff] }
 0x108   :  { %v122_v27 = vsub.f32 %v117_v24, %v121_v26  ;;  %140 = vst.msk [vmem:[#allocation4] sm:$0xff] %vm25_vm1, %v121_v26  ;;  %129 = vperm.xlu1 %172, %v121_v26  }
 0x10a   :  { %v123_v41 = vmul.f32 1.442695, %v122_v27 }
 0x10d   :  { %v147_v56 = vpop.xlane.xlu0 %146 }
 0x10e   :  { %v148_v61 = vmul.f32 %v147_v56, %v256_v11 }
 0x10f   :  { %v154_v62 = vld [vmem:[#allocation4] sm:$0xff] }
 0x172   :  { %v105_v30 = vpop.permute.xlu1 %104 }
 0x173   :  { %v107_v31 = vsub.f32 %v66_v13, %v105_v30 }
 0x175   :  { %v108_v32 = vmul.f32 1.442695, %v107_v31 }
 0x177   :  { %174 = vpow2.f32 %v108_v32 }
 0x17a   :  { %v130_v33 = vpop.permute.xlu1 %129 }
 0x17b   :  { %v132_v34 = vsub.f32 %v90_v16, %v130_v33 }
 0x17d   :  { %v175_v35 = vpop.eup %174  ;;  %v133_v36 = vmul.f32 1.442695, %v132_v34 }
 0x17e   :  { %v110_v37 = vsel %vm92_vm2, %v175_v35, 0.0 }
 0x17f   :  { %176 = vpow2.f32 %v133_v36  ;;  %111 = vadd.xlane.f32.xlu2 %v110_v37 }
 0x180   :  { %178 = vpow2.f32 %v98_v40 }
 0x181   :  { %180 = vpow2.f32 %v123_v41 }
 0x185   :  { %v177_v38 = vpop.eup %176 }
 0x186   :  { %v135_v39 = vsel %vm92_vm2, %v177_v38, 0.0  ;;  %v179_v42 = vpop.eup %178 }
 0x187   :  { %136 = vadd.xlane.f32.xlu2 %v135_v39  ;;  %v101_v44 = vmul.f32 %v179_v42, %v100_v43  ;;  %v181_v47 = vpop.eup %180 }
 0x188   :  { %v126_v49 = vmul.f32 %v181_v47, %v125_v48 }
 0x1f2   :  { %v112_v45 = vpop.xlane.xlu2 %111 }
 0x1f3   :  { %v113_v46 = vadd.f32 %v112_v45, %v101_v44 }
 0x1f5   :  { %115 = vst.msk [vmem:[#allocation3] sm:$0xff] %vm25_vm1, %v113_v46 }
 0x1fa   :  { %v137_v50 = vpop.xlane.xlu2 %136 }
 0x1fb   :  { %v138_v51 = vadd.f32 %v137_v50, %v126_v49 }
 0x1fc   :  { %v150_v52 = vld [vmem:[#allocation3] sm:$0xff] }
 0x1fd   :  { %139 = vst.msk [vmem:[#allocation5] sm:$0xff] %vm25_vm1, %v138_v51  ;;  %182 = vlog2.f32 %v150_v52 }
 0x203   :  { %v183_v54 = vpop.eup %182 }
 0x204   :  { %v155_v53 = vld [vmem:[#allocation5] sm:$0xff]  ;;  %v152_v55 = vmul.f32 0.6931472, %v183_v54 }
 0x205   :  { %184 = vlog2.f32 %v155_v53 }
 0x206   :  { %v153_v59 = vadd.f32 %v152_v55, %v149_v58 }
 0x208   :  { %v159_v0 = vsub.f32 %v153_v59, %v148_v61 }
 0x20b   :  { %v185_v57 = vpop.eup %184 }
 0x20c   :  { %v157_v60 = vmul.f32 0.6931472, %v185_v57 }
 0x20e   :  { %v158_v63 = vadd.f32 %v157_v60, %v154_v62 }
 0x210   :  { %v160_v1 = vsub.f32 %v158_v63, %v148_v61 }
 0x212   :  { %v161_v2 = vadd.f32 %v160_v1, %v159_v0 }
 0x214   :  { %162 = vst.msk [vmem:[%s281_s5] sm:$0xff] %vm25_vm1, %v161_v2 }

</bundles_post_ra>
